<compile_context>
chip_gen: v5e
topology: v5e:2x2
jax: 0.10.0
libtpu: 0.0.40
codegen_flags: <defaults>
</compile_context>

<pallas_src>
import math

import jax
import jax.numpy as jnp
from jax.experimental import pallas as pl
from jax.experimental.pallas import tpu as pltpu

EPS = 1e-6


def _layer_norm(h, alpha, bias):
    """torch LayerNormalization: mean, unbiased std (ddof=1), / (std + eps)."""
    d = h.shape[-1]
    mean = jnp.mean(h, axis=-1, keepdims=True)
    c = h - mean
    var = jnp.sum(c * c, axis=-1, keepdims=True) * (1.0 / (d - 1))  # two-pass, no cancel
    inv = pl.reciprocal(jnp.sqrt(var) + EPS, approx=True)           # EUP (free slot)
    return alpha * (c * inv) + bias


# -------- stage 1: LN1 + fused QKV projection, emitted head-major bf16 --------

def _make_proj_kernel(ts, D, H):
    Dh = D // H

    def kernel(x_ref, ln_a_ref, ln_b_ref, wqkv_ref, bqkv_ref, q_ref, k_ref, v_ref):
        h = _layer_norm(x_ref[0], ln_a_ref[...], ln_b_ref[...])              # (ts, D)
        qkv = jnp.dot(h.astype(jnp.bfloat16), wqkv_ref[...],
                      preferred_element_type=jnp.float32) + bqkv_ref[...]    # (ts, 3D)

        def heads(t):                     # (ts, D) -> (H, ts, Dh); once per token
            return jnp.swapaxes(t.reshape(ts, H, Dh), 0, 1).astype(jnp.bfloat16)

        q_ref[0] = heads(qkv[:, 0 * D:1 * D])   # Q columns already carry 1/sqrt(Dh)
        k_ref[0] = heads(qkv[:, 1 * D:2 * D])
        v_ref[0] = heads(qkv[:, 2 * D:3 * D])

    return kernel


# --- stage 2: flash attention (online softmax) + out-proj + residual + LN2 + FFN

def _make_attn_kernel(tq, D, H):
    Dh = D // H

    def kernel(xq_ref, q_ref, k_ref, v_ref, mask_ref,
               wo_ref, bo_ref, ln2a_ref, ln2b_ref,
               w1_ref, b1_ref, w2_ref, b2_ref,
               o_ref, m_scr, l_scr, acc_scr):
        kv = pl.program_id(2)

        @pl.when(kv == 0)
        def _():
            m_scr[...] = jnp.full(m_scr.shape, -jnp.inf, m_scr.dtype)
            l_scr[...] = jnp.zeros(l_scr.shape, l_scr.dtype)
            acc_scr[...] = jnp.zeros(acc_scr.shape, acc_scr.dtype)

        # ---- online-softmax update for this K/V tile (no (H,tq,S) tensor) ----
        scores = jnp.einsum('hqd,hkd->hqk', q_ref[0], k_ref[0],
                            preferred_element_type=jnp.float32)           # (H,tq,tk)
        neg = mask_ref[0] == 0                       # (tq, tk) once, broadcast to heads
        scores = jnp.where(neg[None, :, :], -1e9, scores)                 # masked_fill

        m_prev = m_scr[...]
        m_new = jnp.maximum(m_prev, jnp.max(scores, axis=-1, keepdims=True))
        alpha = jnp.exp(m_prev - m_new)
        p = jnp.exp(scores - m_new)                  # TODO(synk): bf16 exp on v6e/v7x
        l_scr[...] = alpha * l_scr[...] + jnp.sum(p, axis=-1, keepdims=True)
        acc_scr[...] = alpha * acc_scr[...] + jnp.einsum(
            'hqk,hkd->hqd', p.astype(jnp.bfloat16), v_ref[0],
            preferred_element_type=jnp.float32)
        m_scr[...] = m_new

        # ---- finalize once per query tile: out-proj, residuals, LN2, FFN ----
        @pl.when(kv == pl.num_programs(2) - 1)
        def _():
            ctx = acc_scr[...] * pl.reciprocal(l_scr[...], approx=True)   # (H,tq,Dh)
            attn = jnp.swapaxes(ctx, 0, 1).reshape(tq, D)                 # once / tile
            attn = jnp.dot(attn.astype(jnp.bfloat16), wo_ref[...],
                           preferred_element_type=jnp.float32) + bo_ref[...]
            x1 = xq_ref[0] + attn                    # dropout (eval mode) == identity

            h2 = _layer_norm(x1, ln2a_ref[...], ln2b_ref[...])
            ff = jnp.dot(h2.astype(jnp.bfloat16), w1_ref[...],
                         preferred_element_type=jnp.float32) + b1_ref[...]
            ff = jnp.maximum(ff, 0.0)
            ff = jnp.dot(ff.astype(jnp.bfloat16), w2_ref[...],
                         preferred_element_type=jnp.float32) + b2_ref[...]
            o_ref[0] = (x1 + ff).astype(o_ref.dtype)  # f32 out to match the module

    return kernel


# ---------------------- VMEM budgeting and tile selection ----------------------

def _round_up(x, m):
    return ((x + m - 1) // m) * m


def _nbytes(a):
    return a.size * a.dtype.itemsize


def _vmem_budget_bytes():
    """Per-core VMEM budget, leaving headroom for Mosaic scratch / DMA buffers."""
    try:
        cap = pltpu.get_tpu_info().vmem_capacity_bytes
    except Exception:            # no query path -> assume the smallest (v7x, 64 MiB)
        cap = 64 << 20
    return min(cap * 3 // 4, 96 << 20)     # ~48 MiB on v7x, 96 MiB on v5e/v6e


_SEQ_TILES = (512, 256, 128, 64, 32, 16, 8)


def _seq_tile_candidates(S):
    return [t for t in _SEQ_TILES if t <= S and S % t == 0] or [S]


def _proj_vmem_bytes(ts, D, H, weight_bytes, copies):
    f32, bf16 = 4, 2
    d_pad = _round_up(D, 128)
    dh_pad = _round_up(D // H, 128)
    blocks = 2 * ts * d_pad * f32 + 3 * 2 * H * ts * dh_pad * bf16
    temps = ts * d_pad * (f32 + bf16) + 3 * ts * d_pad * (f32 + bf16)
    return copies * weight_bytes + blocks + temps


def _attn_vmem_bytes(tq, tk, D, F, H, weight_bytes, copies):
    f32, bf16, i8 = 4, 2, 1
    d_pad = _round_up(D, 128)
    f_pad = _round_up(F, 128)
    dh_pad = _round_up(D // H, 128)
    tk_pad = _round_up(tk, 128)
    blocks = (2 * H * tq * dh_pad * bf16            # Q tile (double-buffered)
              + 2 * 2 * H * tk * dh_pad * bf16      # K, V tiles
              + 2 * tq * d_pad * f32                # x residual tile
              + 2 * tq * d_pad * f32                # output tile
              + 2 * tq * tk_pad * i8)               # mask tile
    scratch = H * tq * dh_pad * f32 + 2 * H * tq * 128 * f32   # acc + lane-padded m, l
    temps = (H * tq * tk_pad * (f32 + bf16)         # scores f32 + p bf16
             + tq * f_pad * (f32 + bf16)            # FFN hidden
             + 3 * tq * d_pad * f32)                # attn / x1 / LN temporaries
    return copies * weight_bytes + blocks + scratch + temps


def _pick_proj_tile(S, D, H, weight_bytes, copies, budget):
    cands = _seq_tile_candidates(S)
    for ts in cands:
        if _proj_vmem_bytes(ts, D, H, weight_bytes, copies) <= budget:
            return ts
    return cands[-1]


def _pick_attn_tiles(S, D, F, H, weight_bytes, copies, budget):
    tq_cands = _seq_tile_candidates(S)
    # The mask tile's lane dim is tk: keep it a multiple of 128 or the full S.
    tk_cands = [t for t in (1024, 512, 256, 128) if t <= S and S % t == 0] or [S]
    for tq in tq_cands:
        for tk in tk_cands:
            if _attn_vmem_bytes(tq, tk, D, F, H, weight_bytes, copies) <= budget:
                return tq, tk
    return tq_cands[-1], tk_cands[-1]


# --------------------------------- wrapper -------------------------------------

def encoder_block(x, src_mask, params, num_heads):
    """x: (B, S, D) f32; src_mask: (B, S, S), nonzero = attend, 0 = masked."""
    B, S, D = x.shape
    F = params['w1'].shape[1]
    H = num_heads
    assert D % H == 0
    Dh = D // H
    scale = 1.0 / math.sqrt(Dh)
    f32, bf16 = jnp.float32, jnp.bfloat16

    # Fused QKV weight; the 1/sqrt(Dh) score scale is folded into the Q
    # columns / bias (exact), so the kernel never scales the score tile.
    w_qkv = jnp.concatenate(
        [params['wq'] * scale, params['wk'], params['wv']], axis=1).astype(bf16)
    b_qkv = jnp.concatenate(
        [params['bq'] * scale, params['bk'], params['bv']], axis=1).astype(f32)

    proj_weights = [params['ln1_a'].astype(f32), params['ln1_b'].astype(f32),
                    w_qkv, b_qkv]
    attn_weights = [params['wo'].astype(bf16), params['bo'].astype(f32),
                    params['ln2_a'].astype(f32), params['ln2_b'].astype(f32),
                    params['w1'].astype(bf16), params['b1'].astype(f32),
                    params['w2'].astype(bf16), params['b2'].astype(f32)]

    # int8 mask: 4x less HBM traffic than f32; 0 = masked, nonzero = attend.
    mask_i8 = (src_mask != 0).astype(jnp.int8)

    budget = _vmem_budget_bytes()
    proj_wbytes = sum(_nbytes(w) for w in proj_weights)
    attn_wbytes = sum(_nbytes(w) for w in attn_weights)

    def run(buffered_weights):
        copies = 1 if buffered_weights else 2

        def wspec(shape):
            idx = lambda *args, _n=len(shape): (0,) * _n   # constant -> fetched once
            if buffered_weights:
                # Weights never change across the grid -> single-buffer them.
                return pl.BlockSpec(shape, idx, pipeline_mode=pl.Buffered(1))
            return pl.BlockSpec(shape, idx)

        # -------- stage 1: LN1 + fused QKV projection (once per token) --------
        ts = _pick_proj_tile(S, D, H, proj_wbytes, copies, budget)
        proj_call = pl.pallas_call(
            _make_proj_kernel(ts, D, H),
            out_shape=(jax.ShapeDtypeStruct((B, H, S, Dh), bf16),
                       jax.ShapeDtypeStruct((B, H, S, Dh), bf16),
                       jax.ShapeDtypeStruct((B, H, S, Dh), bf16)),
            grid_spec=pltpu.PrefetchScalarGridSpec(
                num_scalar_prefetch=0,
                grid=(B, S // ts),
                in_specs=[pl.BlockSpec((1, ts, D), lambda b, si: (b, si, 0))]
                         + [wspec(w.shape) for w in proj_weights],
                out_specs=tuple(
                    pl.BlockSpec((1, H, ts, Dh), lambda b, si: (b, 0, si, 0))
                    for _ in range(3)),
            ),
            compiler_params=pltpu.CompilerParams(
                dimension_semantics=("parallel", "parallel"),
                vmem_limit_bytes=budget,
            ),
        )
        q_h, k_h, v_h = proj_call(x, *proj_weights)

        # ----- stage 2: flash attention + out-proj + residuals + LN2 + FFN -----
        tq, tk = _pick_attn_tiles(S, D, F, H, attn_wbytes, copies, budget)
        attn_call = pl.pallas_call(
            _make_attn_kernel(tq, D, H),
            out_shape=jax.ShapeDtypeStruct((B, S, D), f32),
            grid_spec=pltpu.PrefetchScalarGridSpec(
                num_scalar_prefetch=0,
                grid=(B, S // tq, S // tk),
                in_specs=[pl.BlockSpec((1, tq, D), lambda b, qi, ki: (b, qi, 0)),
                          pl.BlockSpec((1, H, tq, Dh), lambda b, qi, ki: (b, 0, qi, 0)),
                          pl.BlockSpec((1, H, tk, Dh), lambda b, qi, ki: (b, 0, ki, 0)),
                          pl.BlockSpec((1, H, tk, Dh), lambda b, qi, ki: (b, 0, ki, 0)),
                          pl.BlockSpec((1, tq, tk), lambda b, qi, ki: (b, qi, ki))]
                         + [wspec(w.shape) for w in attn_weights],
                out_specs=pl.BlockSpec((1, tq, D), lambda b, qi, ki: (b, qi, 0)),
                scratch_shapes=[pltpu.VMEM((H, tq, 1), jnp.float32),    # running max
                                pltpu.VMEM((H, tq, 1), jnp.float32),    # running sum
                                pltpu.VMEM((H, tq, Dh), jnp.float32)],  # running acc
            ),
            compiler_params=pltpu.CompilerParams(
                dimension_semantics=("parallel", "parallel", "arbitrary"),
                vmem_limit_bytes=budget,
            ),
        )
        out = attn_call(x, q_h, k_h, v_h, mask_i8, *attn_weights)
        return jax.block_until_ready(out)

    # Narrow fallback: only API / lowering rejections of pipeline_mode=Buffered(1)
    # fall back to default double-buffered weights. Resource errors (e.g. VMEM OOM,
    # XlaRuntimeError) are NOT caught, so they surface instead of being retried.
    fallback_errors = (TypeError, ValueError, NotImplementedError,
                       getattr(pltpu, "LoweringException", TypeError))
    try:
        return run(buffered_weights=True)
    except fallback_errors:
        return run(buffered_weights=False)


# -------------------------- test harness / reference ---------------------------

def init_params(key, D, F):
    """Deterministic synthetic parameters (linear layers stored as (in, out))."""
    ks = jax.random.split(key, 8)
    s_d = 1.0 / math.sqrt(D)
    s_f = 1.0 / math.sqrt(F)
    return {
        'ln1_a': jnp.ones((1, D), jnp.float32),
        'ln1_b': jnp.zeros((1, D), jnp.float32),
        'ln2_a': jnp.ones((1, D), jnp.float32),
        'ln2_b': jnp.zeros((1, D), jnp.float32),
        'wq': jax.random.normal(ks[0], (D, D), jnp.float32) * s_d,
        'wk': jax.random.normal(ks[1], (D, D), jnp.float32) * s_d,
        'wv': jax.random.normal(ks[2], (D, D), jnp.float32) * s_d,
        'wo': jax.random.normal(ks[3], (D, D), jnp.float32) * s_d,
        'bq': jnp.zeros((1, D), jnp.float32),
        'bk': jnp.zeros((1, D), jnp.float32),
        'bv': jnp.zeros((1, D), jnp.float32),
        'bo': jnp.zeros((1, D), jnp.float32),
        'w1': jax.random.normal(ks[4], (D, F), jnp.float32) * s_d,
        'b1': jnp.zeros((1, F), jnp.float32),
        'w2': jax.random.normal(ks[5], (F, D), jnp.float32) * s_f,
        'b2': jnp.zeros((1, D), jnp.float32),
    }


def _reference(x, src_mask, params, num_heads):
    """Pure-JAX f32 reference matching the PyTorch module (eval mode)."""
    B, S, D = x.shape
    H = num_heads
    Dh = D // H

    def ln(h, a, b):
        mean = jnp.mean(h, axis=-1, keepdims=True)
        std = jnp.std(h, axis=-1, keepdims=True, ddof=1)
        return a * (h - mean) / (std + EPS) + b

    h = ln(x, params['ln1_a'], params['ln1_b'])
    q = h @ params['wq'] + params['bq']
    k = h @ params['wk'] + params['bk']
    v = h @ params['wv'] + params['bv']
    split = lambda t: jnp.transpose(t.reshape(B, S, H, Dh), (0, 2, 1, 3))
    qh, kh, vh = split(q), split(k), split(v)
    s = jnp.einsum('bhqd,bhkd->bhqk', qh, kh) / math.sqrt(Dh)
    s = jnp.where(src_mask[:, None, :, :] == 0, -1e9, s)
    p = jax.nn.softmax(s, axis=-1)
    ctx = jnp.einsum('bhqk,bhkd->bhqd', p, vh)
    attn = jnp.transpose(ctx, (0, 2, 1, 3)).reshape(B, S, D) @ params['wo'] + params['bo']
    x1 = x + attn
    h2 = ln(x1, params['ln2_a'], params['ln2_b'])
    ff = jnp.maximum(h2 @ params['w1'] + params['b1'], 0.0) @ params['w2'] + params['b2']
    return x1 + ff


if __name__ == "__main__":
    B, S, D, H, F = 2, 8, 32, 4, 64
    key = jax.random.PRNGKey(0)
    kx, kp = jax.random.split(key)

    x = jax.random.normal(kx, (B, S, D), jnp.float32)

    # src_mask: 1 = attend, 0 = masked. Batch 1 masks its last 2 key positions.
    src_mask = jnp.ones((B, S, S), jnp.float32)
    src_mask = src_mask.at[1, :, S - 2:].set(0.0)

    params = init_params(kp, D, F)

    out = encoder_block(x, src_mask, params, num_heads=H)
    out = jax.block_until_ready(out)

    ref = _reference(x, src_mask, params, num_heads=H)
    max_err = float(jnp.max(jnp.abs(out - ref)))

    assert out.shape == (B, S, D)
    assert bool(jnp.all(jnp.isfinite(out)))
    # bf16 matmuls + approx reciprocals => tolerance check, not bit-exactness.
    assert max_err < 0.2, f"max abs err vs f32 reference: {max_err}"
    print("KERNEL_OK")
</pallas_src>

<mosaic_0001>
module attributes {stable_mosaic.version = 11 : i64} {
  func.func @kernel(%arg0: i32, %arg1: i32, %arg2: memref<1x8x32xf32, #tpu.memory_space<vmem>>, %arg3: memref<1x32xf32, #tpu.memory_space<vmem>>, %arg4: memref<1x32xf32, #tpu.memory_space<vmem>>, %arg5: memref<32x96xbf16, #tpu.memory_space<vmem>>, %arg6: memref<1x96xf32, #tpu.memory_space<vmem>>, %arg7: memref<1x4x8x8xbf16, #tpu.memory_space<vmem>>, %arg8: memref<1x4x8x8xbf16, #tpu.memory_space<vmem>>, %arg9: memref<1x4x8x8xbf16, #tpu.memory_space<vmem>>) attributes {dimension_semantics = [#tpu.dimension_semantics<parallel>, #tpu.dimension_semantics<parallel>], iteration_bounds = array<i64: 2, 1>, scalar_prefetch = 0 : i64, scratch_operands = 0 : i64, tpu.core_type = #tpu.core_type<tc>, window_params = [{transform_indices = @transform_0, window_bounds = array<i64: 1, 8, 32>}, {pipeline_mode = #tpu.pipeline_mode<synchronous>, transform_indices = @transform_1, window_bounds = array<i64: 1, 32>}, {pipeline_mode = #tpu.pipeline_mode<synchronous>, transform_indices = @transform_2, window_bounds = array<i64: 1, 32>}, {pipeline_mode = #tpu.pipeline_mode<synchronous>, transform_indices = @transform_3, window_bounds = array<i64: 32, 96>}, {pipeline_mode = #tpu.pipeline_mode<synchronous>, transform_indices = @transform_4, window_bounds = array<i64: 1, 96>}, {transform_indices = @transform_5, window_bounds = array<i64: 1, 4, 8, 8>}, {transform_indices = @transform_6, window_bounds = array<i64: 1, 4, 8, 8>}, {transform_indices = @transform_7, window_bounds = array<i64: 1, 4, 8, 8>}]} {
    %c0 = arith.constant 0 : index
    %c0_0 = arith.constant 0 : index
    %c0_1 = arith.constant 0 : index
    %0 = vector.load %arg2[%c0, %c0_0, %c0_1] : memref<1x8x32xf32, #tpu.memory_space<vmem>>, vector<1x8x32xf32>
    %1 = vector.shape_cast %0 : vector<1x8x32xf32> to vector<8x32xf32>
    %c0_2 = arith.constant 0 : index
    %c0_3 = arith.constant 0 : index
    %2 = vector.load %arg3[%c0_2, %c0_3] : memref<1x32xf32, #tpu.memory_space<vmem>>, vector<1x32xf32>
    %c0_4 = arith.constant 0 : index
    %c0_5 = arith.constant 0 : index
    %3 = vector.load %arg4[%c0_4, %c0_5] : memref<1x32xf32, #tpu.memory_space<vmem>>, vector<1x32xf32>
    %cst = arith.constant dense<0.000000e+00> : vector<8xf32>
    %4 = vector.multi_reduction <add>, %1, %cst [1] : vector<8x32xf32> to vector<8xf32>
    %5 = vector.shape_cast %4 : vector<8xf32> to vector<8x1xf32>
    %cst_6 = arith.constant 3.200000e+01 : f32
    %6 = vector.broadcast %cst_6 : f32 to vector<8x1xf32>
    %7 = arith.divf %5, %6 : vector<8x1xf32>
    %8 = vector.broadcast %7 : vector<8x1xf32> to vector<8x32xf32>
    %9 = arith.subf %1, %8 : vector<8x32xf32>
    %10 = arith.mulf %9, %9 : vector<8x32xf32>
    %cst_7 = arith.constant dense<0.000000e+00> : vector<8xf32>
    %11 = vector.multi_reduction <add>, %10, %cst_7 [1] : vector<8x32xf32> to vector<8xf32>
    %12 = vector.shape_cast %11 : vector<8xf32> to vector<8x1xf32>
    %cst_8 = arith.constant 0.0322580636 : f32
    %13 = vector.broadcast %cst_8 : f32 to vector<8x1xf32>
    %14 = arith.mulf %12, %13 : vector<8x1xf32>
    %15 = math.sqrt %14 : vector<8x1xf32>
    %cst_9 = arith.constant 9.99999997E-7 : f32
    %16 = vector.broadcast %cst_9 : f32 to vector<8x1xf32>
    %17 = arith.addf %15, %16 : vector<8x1xf32>
    %18 = tpu.reciprocal %17 {approx = true} : vector<8x1xf32> -> vector<8x1xf32>
    %19 = vector.broadcast %18 : vector<8x1xf32> to vector<8x32xf32>
    %20 = arith.mulf %9, %19 : vector<8x32xf32>
    %21 = vector.broadcast %2 : vector<1x32xf32> to vector<8x32xf32>
    %22 = arith.mulf %21, %20 : vector<8x32xf32>
    %23 = vector.broadcast %3 : vector<1x32xf32> to vector<8x32xf32>
    %24 = arith.addf %22, %23 : vector<8x32xf32>
    %25 = arith.truncf %24 : vector<8x32xf32> to vector<8x32xbf16>
    %c0_10 = arith.constant 0 : index
    %c0_11 = arith.constant 0 : index
    %26 = vector.load %arg5[%c0_10, %c0_11] : memref<32x96xbf16, #tpu.memory_space<vmem>>, vector<32x96xbf16>
    %cst_12 = arith.constant dense<0.000000e+00> : vector<8x96xf32>
    %27 = tpu.matmul %25, %26, %cst_12 {dimension_numbers = #tpu.dot_dimension_numbers<[1], [0], [0], [1], [0, 0, 1, 1], [], []>} : vector<8x32xbf16>, vector<32x96xbf16>, vector<8x96xf32> -> vector<8x96xf32>
    %c0_13 = arith.constant 0 : index
    %c0_14 = arith.constant 0 : index
    %28 = vector.load %arg6[%c0_13, %c0_14] : memref<1x96xf32, #tpu.memory_space<vmem>>, vector<1x96xf32>
    %29 = vector.broadcast %28 : vector<1x96xf32> to vector<8x96xf32>
    %30 = arith.addf %27, %29 : vector<8x96xf32>
    %31 = vector.extract_strided_slice %30 {offsets = [0, 0], sizes = [8, 32], strides = [1, 1]} : vector<8x96xf32> to vector<8x32xf32>
    %32 = vector.shape_cast %31 : vector<8x32xf32> to vector<8x4x8xf32>
    %33 = tpu.transpose %32, [1, 0, 2] : vector<8x4x8xf32> -> vector<4x8x8xf32>
    %34 = arith.truncf %33 : vector<4x8x8xf32> to vector<4x8x8xbf16>
    %c0_15 = arith.constant 0 : index
    %c0_16 = arith.constant 0 : index
    %c0_17 = arith.constant 0 : index
    %c0_18 = arith.constant 0 : index
    %35 = vector.load %arg7[%c0_15, %c0_16, %c0_17, %c0_18] : memref<1x4x8x8xbf16, #tpu.memory_space<vmem>>, vector<1x4x8x8xbf16>
    %36 = vector.shape_cast %35 : vector<1x4x8x8xbf16> to vector<4x8x8xbf16>
    %37 = vector.shape_cast %34 : vector<4x8x8xbf16> to vector<1x4x8x8xbf16>
    tpu.vector_store %arg7[%c0_15, %c0_16, %c0_17, %c0_18], %37 {strides = array<i32>} : memref<1x4x8x8xbf16, #tpu.memory_space<vmem>>, vector<1x4x8x8xbf16>,
    %38 = vector.extract_strided_slice %30 {offsets = [0, 32], sizes = [8, 32], strides = [1, 1]} : vector<8x96xf32> to vector<8x32xf32>
    %39 = vector.shape_cast %38 : vector<8x32xf32> to vector<8x4x8xf32>
    %40 = tpu.transpose %39, [1, 0, 2] : vector<8x4x8xf32> -> vector<4x8x8xf32>
    %41 = arith.truncf %40 : vector<4x8x8xf32> to vector<4x8x8xbf16>
    %c0_19 = arith.constant 0 : index
    %c0_20 = arith.constant 0 : index
    %c0_21 = arith.constant 0 : index
    %c0_22 = arith.constant 0 : index
    %42 = vector.load %arg8[%c0_19, %c0_20, %c0_21, %c0_22] : memref<1x4x8x8xbf16, #tpu.memory_space<vmem>>, vector<1x4x8x8xbf16>
    %43 = vector.shape_cast %42 : vector<1x4x8x8xbf16> to vector<4x8x8xbf16>
    %44 = vector.shape_cast %41 : vector<4x8x8xbf16> to vector<1x4x8x8xbf16>
    tpu.vector_store %arg8[%c0_19, %c0_20, %c0_21, %c0_22], %44 {strides = array<i32>} : memref<1x4x8x8xbf16, #tpu.memory_space<vmem>>, vector<1x4x8x8xbf16>,
    %45 = vector.extract_strided_slice %30 {offsets = [0, 64], sizes = [8, 32], strides = [1, 1]} : vector<8x96xf32> to vector<8x32xf32>
    %46 = vector.shape_cast %45 : vector<8x32xf32> to vector<8x4x8xf32>
    %47 = tpu.transpose %46, [1, 0, 2] : vector<8x4x8xf32> -> vector<4x8x8xf32>
    %48 = arith.truncf %47 : vector<4x8x8xf32> to vector<4x8x8xbf16>
    %c0_23 = arith.constant 0 : index
    %c0_24 = arith.constant 0 : index
    %c0_25 = arith.constant 0 : index
    %c0_26 = arith.constant 0 : index
    %49 = vector.load %arg9[%c0_23, %c0_24, %c0_25, %c0_26] : memref<1x4x8x8xbf16, #tpu.memory_space<vmem>>, vector<1x4x8x8xbf16>
    %50 = vector.shape_cast %49 : vector<1x4x8x8xbf16> to vector<4x8x8xbf16>
    %51 = vector.shape_cast %48 : vector<4x8x8xbf16> to vector<1x4x8x8xbf16>
    tpu.vector_store %arg9[%c0_23, %c0_24, %c0_25, %c0_26], %51 {strides = array<i32>} : memref<1x4x8x8xbf16, #tpu.memory_space<vmem>>, vector<1x4x8x8xbf16>,
    return
  }
  func.func @transform_0(%arg0: i32, %arg1: i32) -> (i32, i32, i32) {
    %c0_i32 = arith.constant 0 : i32
    %c0_i32_0 = arith.constant 0 : i32
    return %arg0, %arg1, %c0_i32 : i32, i32, i32
  }
  func.func @transform_1(%arg0: i32, %arg1: i32) -> (i32, i32) {
    %c0_i32 = arith.constant 0 : i32
    %c0_i32_0 = arith.constant 0 : i32
    %c0_i32_1 = arith.constant 0 : i32
    return %c0_i32, %c0_i32_0 : i32, i32
  }
  func.func @transform_2(%arg0: i32, %arg1: i32) -> (i32, i32) {
    %c0_i32 = arith.constant 0 : i32
    %c0_i32_0 = arith.constant 0 : i32
    %c0_i32_1 = arith.constant 0 : i32
    return %c0_i32, %c0_i32_0 : i32, i32
  }
  func.func @transform_3(%arg0: i32, %arg1: i32) -> (i32, i32) {
    %c0_i32 = arith.constant 0 : i32
    %c0_i32_0 = arith.constant 0 : i32
    %c0_i32_1 = arith.constant 0 : i32
    return %c0_i32, %c0_i32_0 : i32, i32
  }
  func.func @transform_4(%arg0: i32, %arg1: i32) -> (i32, i32) {
    %c0_i32 = arith.constant 0 : i32
    %c0_i32_0 = arith.constant 0 : i32
    %c0_i32_1 = arith.constant 0 : i32
    return %c0_i32, %c0_i32_0 : i32, i32
  }
  func.func @transform_5(%arg0: i32, %arg1: i32) -> (i32, i32, i32, i32) {
    %c0_i32 = arith.constant 0 : i32
    %c0_i32_0 = arith.constant 0 : i32
    %c0_i32_1 = arith.constant 0 : i32
    return %arg0, %c0_i32, %arg1, %c0_i32_0 : i32, i32, i32, i32
  }
  func.func @transform_6(%arg0: i32, %arg1: i32) -> (i32, i32, i32, i32) {
    %c0_i32 = arith.constant 0 : i32
    %c0_i32_0 = arith.constant 0 : i32
    %c0_i32_1 = arith.constant 0 : i32
    return %arg0, %c0_i32, %arg1, %c0_i32_0 : i32, i32, i32, i32
  }
  func.func @transform_7(%arg0: i32, %arg1: i32) -> (i32, i32, i32, i32) {
    %c0_i32 = arith.constant 0 : i32
    %c0_i32_0 = arith.constant 0 : i32
    %c0_i32_1 = arith.constant 0 : i32
    return %arg0, %c0_i32, %arg1, %c0_i32_0 : i32, i32, i32, i32
  }
}

</mosaic_0001>

<bundles_post_ra>
// kernel: tpu_custom_call.1
= control target key start
LH: loop header
LB: loop body
LE: loop exit
PB: predicated region body
PF: predicated region fallthrough
CT: control target
= control target key end

     0   :  { %s1899_s0 = inlined_call_operand.hbm [shape: f32[2,8,32], index: 0, kind: input, shape index: {}]   ;;  %s1900_s1 = inlined_call_operand.hbm [shape: f32[1,32], index: 1, kind: input, shape index: {}]   ;;  %s1901_s2 = inlined_call_operand.vmem [shape: f32[1,32], index: 2, kind: input, shape index: {}]   ;;  %s1902_s3 = inlined_call_operand.hbm [shape: bf16[32,96], index: 3, kind: input, shape index: {}]   ;;  %s1903_s4 = inlined_call_operand.vmem [shape: f32[1,96], index: 4, kind: input, shape index: {}]   ;;  %s1904_s5 = inlined_call_operand.hbm [shape: bf16[2,4,8,8], index: 5, kind: output, shape index: {0}]   ;;  %s1905_s6 = inlined_call_operand.hbm [shape: bf16[2,4,8,8], index: 6, kind: output, shape index: {1}]   ;;  %s1906_s7 = inlined_call_operand.hbm [shape: bf16[2,4,8,8], index: 7, kind: output, shape index: {2}]  }
   0x1   :  { %1910 = sst [smem:[#allocation16_spill]] %s1899_s0 }
   0x2   :  { %1911 = sst [smem:[#allocation17_spill]] %s1900_s1 }
   0x3   :  { %1912 = sst [smem:[#allocation18_spill]] %s1901_s2 }
   0x4   :  { %1913 = sst [smem:[#allocation19_spill]] %s1902_s3 }
   0x5   :  { %13 = vsyncpa [#allocation3], 0 }
   0x6   :  { %15 = vsyncpa [#allocation3 + $0x1], 0 }
   0x7   :  { %16 = vsyncpa [#allocation6], 0 }
   0x8   :  { %17 = vsyncpa [#allocation4], 0 }
   0x9   :  { %19 = vsyncpa [#allocation4 + $0x1], 0 }
   0xa   :  { %20 = vsyncpa [#allocation10], 0 }
   0xb   :  { %22 = vsyncpa [#allocation10 + $0x1], 0  ;;  %s1535_s24 = smov 0   ;;  %s1537_s25 = smov 0  }
   0xc   :  { %s1539_s26 = smov 0   ;;  %s1541_s27 = smov 0  }
   0xd   :  { %s1543_s28 = smov 0   ;;  %s1545_s29 = smov 0  }
   0xe LB: > { %s1566_s30 = sadd.s32 4294967295, %s1480_s29   ;;  %s1907_s8 = sadd.s32 4294967294, %s1480_s29   ;;  %s1480_s29 = sphi %s1545_s29, %s28_s29   ;;  %s1476_s28 = sphi %s1543_s28, %s1928_s28   ;;  %s1472_s27 = sphi %s1541_s27, %s1927_s27   ;;  %s1468_s26 = sphi %s1539_s26, %s1926_s26   ;;  %s1464_s25 = sphi %s1537_s25, %s1925_s25   ;;  %s1460_s24 = sphi %s1535_s24, %s1924_s24  }
   0xf   : > { %p62_p0 = scmp.ne.s32.totalorder %s1464_s25, %s1460_s24  ;;  %p63_p1 = scmp.eq.s32.totalorder %s1566_s30, 0 }
  0x10   : > { %p178_p2 = scmp.eq.s32.totalorder %s1907_s8, 1  ;;  %p1073_p4 = scmp.ge.s32.totalorder %s1480_s29, 1 }
  0x11   : > { %p1576_p3 = por %p63_p1, %p62_p0  ;;  %p241_p6 = scmp.lt.s32.totalorder %s1480_s29, 3 }
  0x12   : > { %p1581_p5 = por %p178_p2, %p62_p0  ;;  %s1916_s1 = sld [smem:[#allocation17_spill]] }
  0x13   : > { %p1589_p7 = pnand %p1073_p4, %p241_p6  ;;  %p1076_p8 = scmp.ge.s32.totalorder %s1480_s29, 2 }
  0x14   : > { %s1482_s15 = smov [#allocation5]   ;;  %s1918_s3 = sld [smem:[#allocation19_spill]] }
  0x15   : > { %p1127_p9 = pneg %p1589_p7  ;;  %s255_s16 = sshll.u32 %s1482_s15, 4  ;;  %s256_s16 = int_to_ptr.vmem [resolvable:$true] %s255_s16 }
  0x16   : > { %s1483_s20 = smov [#allocation7]   ;;  %s1484_s22 = smov 64  }
  0x17   : > { %p1128_p10 = pnand %p1127_p9, %p63_p1  ;;  %s269_s21 = sshll.u32 %s1483_s20, 4  ;;  %s270_s21 = int_to_ptr.vmem [resolvable:$true] %s269_s21 }
  0x18   : > { %s253_s13 = sshll.u32 %s1916_s1, 4  ;;  %s1485_s23 = smov 4   ;;  %s254_s13 = int_to_ptr.hbm [resolvable:$true] %s253_s13 }
  0x19   : > { %1130 = dma.hbm_to_vmem [thread:$0]  (!%p1128_p10), %s254_s13, 16, %s256_s16, [#allocation6]  }
  0x1a   : > { %s267_s19 = sshll.u32 %s1918_s3, 4  ;;  %p172_p11 = scmp.eq.s32.totalorder %s1566_s30, 1  ;;  %s268_s19 = int_to_ptr.hbm [resolvable:$true] %s267_s19 }
  0x1b   : > { %1133 = dma.hbm_to_vmem [thread:$0]  (!%p1128_p10), %s268_s19, 256, %s270_s21, [#allocation6], %s1484_s22, %s1484_s22, %s1485_s23  }
  0x1c   : > { %s40_s11 = sadd.s32 1, %s1476_s28  ;;  %s49_s12 = sadd.s32 1, %s1468_s26 }
  0x1d   : > { %p42_p12 = scmp.ge.s32.totalorder %s40_s11, 2  ;;  %p56_p13 = scmp.ne.s32.totalorder %s1468_s26, %s1464_s25 }
  0x1e   : > { %p57_p0 = scmp.eq.s32.totalorder %s1480_s29, 0  ;;  %p1150_p4 = scmp.lt.s32.totalorder %s1480_s29, 2 }
  0x1f   : > { %s1930_s11 = smov (%p42_p12, %s40_s11), 0  ;;  %p1609_p2 = por %p172_p11, %p56_p13 }
  0x20   : > { %s44_s13 = ssub.s32 %s1476_s28, %s1930_s11  ;;  %s286_s16 = sand.u32 1, %s1468_s26  }
  0x21   : > { %p47_p6 = scmp.eq.s32.totalorder %s44_s13, 0  ;;  %p58_p9 = por %p57_p0, %p56_p13 }
  0x22   : > { %s1077_s17 = sshll.u32 %s286_s16, 3  ;;  %s1078_s18 = sshll.u32 %s1476_s28, 3 }
  0x23   : > { %s1619_s19 = scalar_select %p47_p6, %s1468_s26, %s49_s12  }
  0x24   : > { %s1920_s0 = sld [smem:[#allocation16_spill]]  ;;  %s290_s8 = scalar_lea.vmem [#allocation2], %s1077_s17 }
  0x25   : > { %s299_s1 = sshll.u32 %s290_s8, 4  ;;  %p1135_p10 = pnand %p1150_p4, %p58_p9  ;;  %s300_s1 = int_to_ptr.vmem [resolvable:$true] %s299_s1 }
  0x26   : > { %s287_s3 = scalar_lea.sflag [#allocation3], %s286_s16  ;;  %s1629_s12 = sand.u32 (!%p1589_p7), 1, %s1464_s25  }
  0x27   : > { %s1080_s13 = sshll.u32 (!%p1589_p7), %s1629_s12, 3 }
  0x28   : > { %308 = sbr.rel (%p1589_p7) target bundleno = 748 (0x2ec), region = 40  ;;  %s314_s20 = scalar_lea.vmem (!%p1589_p7), [#allocation2], %s1080_s13 }
  0x2a   : > { %s295_s22 = scalar_lea.hbm %s1920_s0, %s1078_s18  ;;  %s311_s18 = scalar_lea.sflag (!%p1589_p7), [#allocation3], %s1629_s12 }
  0x2b   : > { %s297_s23 = sshll.u32 %s295_s22, 4  ;;  %s298_s23 = int_to_ptr.hbm [resolvable:$true] %s297_s23 }
  0x2c   : > { %1137 = dma.hbm_to_vmem [thread:$0]  (!%p1135_p10), %s298_s23, 128, %s300_s1, %s287_s3  }
  0x2d   : > { %1443 = dma.done.wait (%p1576_p3), %s311_s18, 128  }
  0x2e   : > { %1445 = vsyncadd (%p1576_p3), %s311_s18, 4294967168 }
  0x2f   : > { %1447 = dma.done.wait (%p63_p1), [#allocation6], 272  }
  0x30   : > { %1449 = vsyncadd (%p63_p1), [#allocation6], 4294967024  ;;  %vm370_vm0 = vcmask 261120   ;;  %v367_v0 = vld [vmem:[%s314_s20] sm:$0xff]  ;;  %v1486_v2 = vmov 32.0   ;;  %v1106_v15 = vld [vmem:[#allocation7] sm:$0xff] }
  0x31   : > { %v371_v1 = vsel %vm370_vm0, %v367_v0, 0.0  ;;  %1238 = vrcp.f32 %v1486_v2  ;;  %v1107_v14 = vld [vmem:[#allocation7 + $0x8] sm:$0xff]  ;;  %v1235_v29 = vld [vmem:[#allocation5] ss:$0 sm:$0xff]  ;;  %s1921_s2 = sld [smem:[#allocation18_spill]]  ;;  %s1487_s14 = smov 104  }
  0x32   : > { %372 = vadd.xlane.f32.xlu0 %v371_v1  ;;  %441 = vmatpush.bf16.msra.mxu0 %v1107_v14  ;;  %v1237_v36 = vld [vmem:[%s1903_s4] ss:$0 sm:$0xff]  ;;  %s1488_s16 = smov 112   ;;  %s1489_s17 = smov 120   ;;  %v1490_v40 = vmov 1983009808  }
  0x33   : > { %v464_v41 = vunpack.c.l.s4 %v1490_v40  ;;  %vm459_vm4 = vcmask 1047556   ;;  %s1908_s21 = smov 64   ;;  %s1492_s22 = smov 96   ;;  %v1493_v49 = vmov 1934713408   ;;  %vm573_vm5 = vcmask 60416  }
  0x34   : > { %v488_v50 = vunpack.c.l.s4 %v1493_v49  ;;  %s1689_s23 = sshll.u32 %s1629_s12, 4  ;;  %s1705_s18 = sshll.u32 %s1472_s27, 4 }
  0x35   : > { %v1652_v48 = vunpack.c.0.s8 %v464_v41  ;;  %s351_s13 = scalar_lea.vmem [#allocation8], %s1689_s23  ;;  %s861_s3 = scalar_lea.hbm %s1904_s5, %s1705_s18 }
  0x36   : > { %442 = vmatpush.bf16.msra.mxu0 %v1106_v15  ;;  %v1657_v55 = vunpack.c.0.s8 %v488_v50  ;;  %s862_s8 = sshll.u32 %s351_s13, 4  ;;  %s864_s9 = sshll.u32 %s861_s3, 4  ;;  %s863_s8 = int_to_ptr.vmem [resolvable:$true] %s862_s8  ;;  %s865_s9 = int_to_ptr.hbm [resolvable:$true] %s864_s9 }
  0x37   : > { %v1239_v3 = vpop.eup %1238  ;;  %v1236_v32 = vld [vmem:[%s1921_s2] ss:$0 sm:$0xff] }
  0x38   : > { %v375_v4 = vmul.f32 32.0, %v1239_v3  ;;  %vm379_vm1 = vweird.f32 %v1239_v3 }
  0x3a   : > { %v376_v5 = vsub.f32 1.0, %v375_v4 }
  0x3c   : > { %v377_v6 = vmul.f32 %v1239_v3, %v376_v5 }
  0x3e   : > { %v378_v7 = vadd.f32 %v1239_v3, %v377_v6 }
  0x40   : > { %v380_v8 = vsel %vm379_vm1, %v1239_v3, %v378_v7 }
  0xa5   : > { %v373_v9 = vpop.xlane.xlu0 %372 }
  0xa6   : > { %v381_v10 = vmul.f32 %v380_v8, %v373_v9 }
  0xa8   : > { %v382_v11 = vsub.f32 %v367_v0, %v381_v10 }
  0xaa   : > { %v383_v12 = vmul.f32 %v382_v11, %v382_v11 }
  0xac   : > { %v384_v13 = vsel %vm370_vm0, %v383_v12, 0.0 }
  0xad   : > { %385 = vadd.xlane.f32.xlu0 %v384_v13 }
 0x120   : > { %v386_v16 = vpop.xlane.xlu0 %385 }
 0x121   : > { %v387_v17 = vmul.f32 0.032258064, %v386_v16 }
 0x123   : > { %1240 = vrsqrt.f32 %v387_v17  ;;  %vm395_vm2 = vcmp.eq.f32.partialorder %v387_v17, inf  ;;  %v398_v25 = vand.u32 2147483648, %v387_v17  ;;  %vm397_vm3 = vcmp.eq.f32.partialorder %v387_v17, 0.0 }
 0x129   : > { %v1241_v18 = vpop.eup %1240 }
 0x12a   : > { %v389_v19 = vmul.f32 %v1241_v18, %v387_v17 }
 0x12c   : > { %v390_v20 = vmul.f32 %v1241_v18, %v389_v19 }
 0x12e   : > { %v391_v21 = vmul.f32 0.5, %v390_v20 }
 0x130   : > { %v392_v22 = vsub.f32 1.5, %v391_v21 }
 0x132   : > { %v393_v23 = vmul.f32 %v1241_v18, %v392_v22 }
 0x134   : > { %v394_v24 = vmul.f32 %v393_v23, %v387_v17 }
 0x136   : > { %v396_v26 = vsel %vm395_vm2, %v387_v17, %v394_v24 }
 0x137   : > { %v399_v27 = vsel %vm397_vm3, %v398_v25, %v396_v26 }
 0x138   : > { %v400_v28 = vadd.f32 1e-06, %v399_v27 }
 0x13a   : > { %1242 = vrcp.f32 %v400_v28 }
 0x140   : > { %v1243_v30 = vpop.eup %1242 }
 0x141   : > { %v402_v31 = vmul.f32 %v1243_v30, %v382_v11 }
 0x143   : > { %v406_v33 = vmul.f32 %v1235_v29, %v402_v31 }
 0x145   : > { %v410_v34 = vadd.f32 %v1236_v32, %v406_v33 }
 0x147   : > { %v411_v35 = vpack.c.bf16 %v410_v34, %v410_v34 }
 0x149   : > { %1094 = vmatmul.msk.bf16.vlgmr.msra.gmra.mxu0 %vm370_vm0, %v411_v35 }
 0x1c6   : > { %v444_v37 = vpop.f32.mrf.mxu0 }
 0x1c7   : > { %v445_v38 = vadd.f32 %v1237_v36, %v444_v37 }
 0x1c9   : > { %455 = vrot.lane.b32.xlu2 %v445_v38, %s1487_s14  ;;  %452 = vrot.lane.b32.xlu1 %v445_v38, %s1488_s16  ;;  %v461_v46 = vrot.slane %v445_v38, 4  ;;  %s839_s14 = scalar_lea.sflag [#allocation4], %s1629_s12  ;;  %s1348_s16 = sshra.s32 %s865_s9, 4  ;;  %s1349_s16 = int_to_ptr.hbm [resolvable:$true] %s1348_s16 }
 0x1ca   : > { %p1355_p11 = scmp.lt.s32.totalorder %s1349_s16, %s1904_s5 }
 0x1ce   : > { %v446_v39 = vpop.f32.mrf.mxu0 }
 0x1d1   : > { %449 = vrot.lane.b32.xlu1 %v445_v38, %s1489_s17  ;;  %s1350_s17 = scalar_lea.hbm %s1349_s16, 16 }
 0x1d2   : > { %p1351_p1 = scmp.ne.s32.totalorder %s1349_s16, %s1350_s17 }
 0x1d4   : > { %p1352_p3 = pnand %p1351_p1, %p1609_p2 }
 0x1d6   : > { %p1353_p7 = pneg %p1352_p3 }
 0x223   : > { %v456_v47 = vpop.permute.xlu2 %455 }
 0x224   : > { %v471_v53 = vrot.slane %v456_v47, 4 }
 0x23b   : > { %v453_v42 = vpop.permute.xlu1 %452 }
 0x23c   : > { %v458_v43 = vrot.slane %v453_v42, 4  ;;  %v1220_v44 = vpack.i.bf16 %v453_v42, %v445_v38  ;;  %v462_v51 = vsel %vm459_vm4, %v453_v42, %v461_v46 }
 0x23d   : > { %v470_v54 = vperm.slane %v462_v51, %v1652_v48 }
 0x23e   : > { %v460_v45 = vsel %vm459_vm4, %v458_v43, %v445_v38  ;;  %1221 = vrot.lane.b32.xlu0 %v1220_v44, %s1908_s21  ;;  %1216 = vrot.lane.b32.xlu2 %v1220_v44, %s1492_s22 }
 0x23f   : > { %v466_v52 = vperm.slane %v460_v45, %v1652_v48  ;;  %v497_v63 = vrot.slane %v470_v54, 4 }
 0x241   : > { %v485_v60 = vrot.slane %v466_v52, 4 }
 0x243   : > { %v450_v56 = vpop.permute.xlu1 %449 }
 0x244   : > { %v472_v57 = vsel %vm459_vm4, %v471_v53, %v450_v56  ;;  %v473_v58 = vrot.slane %v450_v56, 4  ;;  %v1230_v59 = vpack.i.bf16 %v456_v47, %v450_v56 }
 0x245   : > { %v478_v61 = vperm.slane %v472_v57, %v1652_v48 }
 0x246   : > { %v474_v62 = vsel %vm459_vm4, %v456_v47, %v473_v58  ;;  %1231 = vrot.lane.b32.xlu2 %v1230_v59, %s1908_s21  ;;  %1226 = vrot.lane.b32.xlu1 %v1230_v59, %s1492_s22  ;;  %s1354_s21 = scalar_lea.hbm %s1904_s5, 32 }
 0x247   : > { %v482_v0 = vperm.slane %v474_v62, %v1652_v48  ;;  %v483_v1 = vrot.slane %v478_v61, 4  ;;  %v486_v2 = vsel %vm459_vm4, %v478_v61, %v485_v60  ;;  %p1356_p12 = scmp.lt.s32.totalorder %s1354_s21, %s1350_s17 }
 0x248   : > { %v494_v3 = vperm.slane %v486_v2, %v1657_v55 }
 0x249   : > { %v484_v4 = vsel %vm459_vm4, %v483_v1, %v466_v52  ;;  %v495_v5 = vrot.slane %v482_v0, 4  ;;  %v498_v6 = vsel %vm459_vm4, %v482_v0, %v497_v63  ;;  %p1357_p13 = por %p1356_p12, %p1355_p11 }
 0x24a   : > { %v490_v7 = vperm.slane %v484_v4, %v1657_v55  ;;  %v506_v8 = vperm.slane %v498_v6, %v1657_v55  ;;  %v509_v9 = vrot.slane %v494_v3, 4 }
 0x24b   : > { %v496_v10 = vsel %vm459_vm4, %v495_v5, %v470_v54  ;;  %p1358_p0 = pnand %p1357_p13, %p1353_p7 }
 0x24c   : > { %v502_v11 = vperm.slane %v496_v10, %v1657_v55  ;;  %v507_v12 = vrot.slane %v490_v7, 4  ;;  %v510_v13 = vsel %vm459_vm4, 0.0, %v509_v9  ;;  %v513_v14 = vrot.slane %v506_v8, 4 }
 0x24d   : > { %v515_v15 = vsel %vm459_vm4, %v509_v9, %v490_v7  ;;  %v520_v16 = vrot.slane %v510_v13, 4 }
 0x24e   : > { %v508_v17 = vsel %vm459_vm4, 0.0, %v507_v12  ;;  %v511_v18 = vrot.slane %v502_v11, 4  ;;  %v514_v19 = vsel %vm459_vm4, 0.0, %v513_v14  ;;  %v519_v20 = vperm.slane %v515_v15, %v1652_v48 }
 0x24f   : > { %v521_v21 = vsel %vm459_vm4, %v520_v16, %v508_v17  ;;  %v526_v22 = vsel %vm459_vm4, %v513_v14, %v502_v11  ;;  %v531_v23 = vrot.slane %v514_v19, 4 }
 0x250   : > { %v512_v24 = vsel %vm459_vm4, 0.0, %v511_v18  ;;  %v525_v25 = vperm.slane %v521_v21, %v1652_v48  ;;  %v530_v26 = vperm.slane %v526_v22, %v1652_v48  ;;  %v539_v27 = vrot.slane %v519_v20, 4 }
 0x251   : > { %v532_v28 = vsel %vm459_vm4, %v531_v23, %v512_v24 }
 0x252   : > { %v536_v29 = vperm.slane %v532_v28, %v1652_v48  ;;  %v537_v30 = vrot.slane %v525_v25, 4  ;;  %v540_v31 = vsel %vm459_vm4, %v525_v25, %v539_v27  ;;  %v551_v32 = vrot.slane %v530_v26, 4 }
 0x253   : > { %v548_v33 = vperm.slane %v540_v31, %v1657_v55 }
 0x254   : > { %v538_v34 = vsel %vm459_vm4, %v537_v30, %v519_v20  ;;  %v549_v35 = vrot.slane %v536_v29, 4  ;;  %v552_v36 = vsel %vm459_vm4, %v536_v29, %v551_v32 }
 0x255   : > { %v544_v37 = vperm.slane %v538_v34, %v1657_v55  ;;  %v560_v38 = vperm.slane %v552_v36, %v1657_v55  ;;  %v567_v39 = vrot.slane %v548_v33, 4 }
 0x256   : > { %v550_v40 = vsel %vm459_vm4, %v549_v35, %v530_v26 }
 0x257   : > { %v556_v41 = vperm.slane %v550_v40, %v1657_v55  ;;  %v563_v42 = vrot.slane %v544_v37, 4  ;;  %v565_v43 = vrot.slane %v560_v38, 4  ;;  %v568_v44 = vsel %vm459_vm4, %v560_v38, %v567_v39 }
 0x258   : > { %v572_v45 = vpack.c.bf16 %v568_v44, %v568_v44 }
 0x259   : > { %v561_v46 = vrot.slane %v556_v41, 4  ;;  %v564_v47 = vsel %vm459_vm4, %v556_v41, %v563_v42  ;;  %v566_v49 = vsel %vm459_vm4, %v565_v43, %v548_v33 }
 0x25a   : > { %v570_v50 = vpack.c.bf16 %v564_v47, %v564_v47  ;;  %v571_v51 = vpack.c.bf16 %v566_v49, %v566_v49  ;;  %577 = vst.msk [vmem:[%s351_s13 + $0xc] sm:$0xf] %vm573_vm5, %v572_v45 }
 0x25b   : > { %v562_v52 = vsel %vm459_vm4, %v561_v46, %v544_v37 }
 0x25c   : > { %v569_v53 = vpack.c.bf16 %v562_v52, %v562_v52  ;;  %575 = vst.msk [vmem:[%s351_s13 + $0x4] sm:$0xf] %vm573_vm5, %v570_v50 }
 0x25d   : > { %576 = vst.msk [vmem:[%s351_s13 + $0x8] sm:$0xf] %vm573_vm5, %v571_v51 }
 0x25e   : > { %574 = vst.msk [vmem:[%s351_s13] sm:$0xf] %vm573_vm5, %v569_v53 }
 0x25f   : > { %1361 = shalt.err (!%p1358_p0)
}
 0x260   : > { %s1494_s12 = smov 4   ;;  %s1922_s13 = smov 64  }
 0x261   : > { %1121 = dma.vmem_to_hbm [thread:$0]  (%p1609_p2), %s863_s8, 256, %s865_s9, %s839_s14, %s1922_s13, %s1922_s13, %s1494_s12  }
 0x262   : > { %s1785_s0 = scalar_lea.vmem [#allocation11], %s1689_s23  ;;  %s879_s20 = scalar_lea.hbm %s1905_s6, %s1705_s18 }
 0x263   : > { %s897_s8 = scalar_lea.hbm %s1906_s7, %s1705_s18  ;;  %s843_s9 = sand.u32 1, %s1566_s30  }
 0x264   : > { %s358_s14 = scalar_lea.vmem [#allocation9], %s1689_s23  ;;  %s1825_s17 = sshll.u32 %s879_s20, 4  ;;  %s883_s17 = int_to_ptr.hbm [resolvable:$true] %s1825_s17 }
 0x265   : > { %s880_s16 = sshll.u32 %s358_s14, 4  ;;  %s1828_s22 = sshll.u32 %s897_s8, 4  ;;  %s881_s16 = int_to_ptr.vmem [resolvable:$true] %s880_s16  ;;  %s901_s22 = int_to_ptr.hbm [resolvable:$true] %s1828_s22 }
 0x266   : > { %s898_s18 = sshll.u32 %s1785_s0, 4  ;;  %s1839_s30 = scalar_lea.sflag [#allocation10], %s843_s9  ;;  %s1835_s18 = int_to_ptr.vmem [resolvable:$true] %s898_s18 }
 0x267   : > { %s1376_s23 = sshra.s32 %s883_s17, 4  ;;  %s1382_s21 = scalar_lea.hbm %s1905_s6, 32  ;;  %s1377_s23 = int_to_ptr.hbm [resolvable:$true] %s1376_s23 }
 0x268   : > { %s1378_s27 = scalar_lea.hbm %s1377_s23, 16  ;;  %p1383_p10 = scmp.lt.s32.totalorder %s1377_s23, %s1905_s6 }
 0x269   : > { %p1379_p4 = scmp.ne.s32.totalorder %s1377_s23, %s1378_s27  ;;  %p1384_p1 = scmp.lt.s32.totalorder %s1382_s21, %s1378_s27 }
 0x26b   : > { %p1380_p6 = pnand %p1379_p4, %p1609_p2  ;;  %p1385_p3 = por %p1384_p1, %p1383_p10 }
 0x26d   : > { %p1381_p9 = pneg %p1380_p6 }
 0x26f   : > { %p1386_p7 = pnand %p1385_p3, %p1381_p9 }
 0x298   : > { %v1217_v54 = vpop.permute.xlu2 %1216 }
 0x299   : > { %v1219_v61 = vunpack.i.h.bf16 %v1217_v54  ;;  %v1218_v62 = vunpack.i.l.bf16 %v1217_v54 }
 0x29b   : > { %v590_v6 = vrot.slane %v1219_v61, 4  ;;  %v592_v7 = vrot.slane %v1218_v62, 4 }
 0x29d   : > { %v591_v16 = vsel %vm459_vm4, %v590_v6, %v1218_v62  ;;  %v593_v17 = vsel %vm459_vm4, %v1219_v61, %v592_v7 }
 0x29e   : > { %v597_v27 = vperm.slane %v591_v16, %v1652_v48  ;;  %v601_v28 = vperm.slane %v593_v17, %v1652_v48 }
 0x2a0   : > { %v1232_v56 = vpop.permute.xlu2 %1231  ;;  %v616_v39 = vrot.slane %v597_v27, 4  ;;  %v628_v40 = vrot.slane %v601_v28, 4 }
 0x2a1   : > { %v1234_v57 = vunpack.i.h.bf16 %v1232_v56  ;;  %v1233_v58 = vunpack.i.l.bf16 %v1232_v56 }
 0x2a3   : > { %v732_v59 = vrot.slane %v1234_v57, 4  ;;  %v734_v60 = vrot.slane %v1233_v58, 4 }
 0x2a5   : > { %v733_v63 = vsel %vm459_vm4, %v732_v59, %v1233_v58  ;;  %v735_v0 = vsel %vm459_vm4, %v1234_v57, %v734_v60 }
 0x2a6   : > { %v739_v4 = vperm.slane %v733_v63, %v1652_v48  ;;  %v743_v5 = vperm.slane %v735_v0, %v1652_v48 }
 0x2a8   : > { %v744_v12 = vrot.slane %v739_v4, 4  ;;  %v756_v13 = vrot.slane %v743_v5, 4 }
 0x2b0   : > { %v1222_v1 = vpop.permute.xlu0 %1221 }
 0x2b1   : > { %v1224_v2 = vunpack.i.h.bf16 %v1222_v1  ;;  %v1223_v3 = vunpack.i.l.bf16 %v1222_v1 }
 0x2b3   : > { %v720_v8 = vrot.slane %v1224_v2, 4  ;;  %v722_v9 = vrot.slane %v1223_v3, 4 }
 0x2b5   : > { %v721_v10 = vsel %vm459_vm4, %v720_v8, %v1223_v3  ;;  %v723_v11 = vsel %vm459_vm4, %v1224_v2, %v722_v9 }
 0x2b6   : > { %v727_v14 = vperm.slane %v721_v10, %v1652_v48  ;;  %v731_v15 = vperm.slane %v723_v11, %v1652_v48 }
 0x2b8   : > { %v745_v18 = vsel %vm459_vm4, %v744_v12, %v727_v14  ;;  %v746_v19 = vrot.slane %v727_v14, 4  ;;  %v757_v20 = vsel %vm459_vm4, %v756_v13, %v731_v15  ;;  %v758_v21 = vrot.slane %v731_v15, 4  ;;  %v1227_v22 = vpop.permute.xlu1 %1226 }
 0x2b9   : > { %v751_v23 = vperm.slane %v745_v18, %v1657_v55  ;;  %v763_v24 = vperm.slane %v757_v20, %v1657_v55  ;;  %v1229_v25 = vunpack.i.h.bf16 %v1227_v22  ;;  %v1228_v26 = vunpack.i.l.bf16 %v1227_v22 }
 0x2ba   : > { %v747_v29 = vsel %vm459_vm4, %v739_v4, %v746_v19  ;;  %v759_v30 = vsel %vm459_vm4, %v743_v5, %v758_v21 }
 0x2bb   : > { %v755_v31 = vperm.slane %v747_v29, %v1657_v55  ;;  %v767_v32 = vperm.slane %v759_v30, %v1657_v55  ;;  %v602_v33 = vrot.slane %v1229_v25, 4  ;;  %v604_v34 = vrot.slane %v1228_v26, 4 }
 0x2bc   : > { %v768_v35 = vrot.slane %v751_v23, 4  ;;  %v772_v37 = vrot.slane %v763_v24, 4 }
 0x2bd   : > { %v770_v36 = vrot.slane %v755_v31, 4  ;;  %v774_v38 = vrot.slane %v767_v32, 4  ;;  %v603_v41 = vsel %vm459_vm4, %v602_v33, %v1228_v26  ;;  %v605_v42 = vsel %vm459_vm4, %v1229_v25, %v604_v34 }
 0x2be   : > { %v769_v52 = vsel %vm459_vm4, 0.0, %v768_v35  ;;  %v773_v53 = vsel %vm459_vm4, 0.0, %v772_v37  ;;  %v609_v54 = vperm.slane %v603_v41, %v1652_v48  ;;  %v613_v56 = vperm.slane %v605_v42, %v1652_v48 }
 0x2bf   : > { %v771_v43 = vsel %vm459_vm4, 0.0, %v770_v36  ;;  %v775_v44 = vsel %vm459_vm4, 0.0, %v774_v38  ;;  %v776_v45 = vsel %vm459_vm4, %v770_v36, %v751_v23  ;;  %v787_v46 = vsel %vm459_vm4, %v774_v38, %v763_v24 }
 0x2c0   : > { %v780_v47 = vperm.slane %v776_v45, %v1652_v48  ;;  %v781_v49 = vrot.slane %v771_v43, 4  ;;  %v791_v50 = vperm.slane %v787_v46, %v1652_v48  ;;  %v792_v51 = vrot.slane %v775_v44, 4 }
 0x2c1   : > { %v614_v63 = vrot.slane %v609_v54, 4  ;;  %v617_v0 = vsel %vm459_vm4, %v609_v54, %v616_v39  ;;  %v626_v2 = vrot.slane %v613_v56, 4  ;;  %v629_v3 = vsel %vm459_vm4, %v613_v56, %v628_v40 }
 0x2c2   : > { %v782_v57 = vsel %vm459_vm4, %v781_v49, %v769_v52  ;;  %v793_v58 = vsel %vm459_vm4, %v792_v51, %v773_v53  ;;  %v800_v59 = vrot.slane %v780_v47, 4  ;;  %v812_v60 = vrot.slane %v791_v50, 4 }
 0x2c3   : > { %v786_v61 = vperm.slane %v782_v57, %v1652_v48  ;;  %v797_v62 = vperm.slane %v793_v58, %v1652_v48  ;;  %v625_v1 = vperm.slane %v617_v0, %v1657_v55  ;;  %v615_v10 = vsel %vm459_vm4, %v614_v63, %v597_v27 }
 0x2c4   : > { %v627_v11 = vsel %vm459_vm4, %v626_v2, %v601_v28  ;;  %v621_v14 = vperm.slane %v615_v10, %v1657_v55  ;;  %v637_v20 = vperm.slane %v629_v3, %v1657_v55 }
 0x2c5   : > { %v798_v4 = vrot.slane %v786_v61, 4  ;;  %v801_v5 = vsel %vm459_vm4, %v786_v61, %v800_v59  ;;  %v810_v6 = vrot.slane %v797_v62, 4  ;;  %v813_v7 = vsel %vm459_vm4, %v797_v62, %v812_v60 }
 0x2c6   : > { %v809_v8 = vperm.slane %v801_v5, %v1657_v55  ;;  %v821_v9 = vperm.slane %v813_v7, %v1657_v55  ;;  %v633_v15 = vperm.slane %v627_v11, %v1657_v55  ;;  %v638_v21 = vrot.slane %v621_v14, 4 }
 0x2c7   : > { %v799_v12 = vsel %vm459_vm4, %v798_v4, %v780_v47  ;;  %v811_v13 = vsel %vm459_vm4, %v810_v6, %v791_v50  ;;  %v640_v22 = vrot.slane %v625_v1, 4  ;;  %v644_v34 = vrot.slane %v637_v20, 4 }
 0x2c8   : > { %v805_v16 = vperm.slane %v799_v12, %v1657_v55  ;;  %v817_v17 = vperm.slane %v811_v13, %v1657_v55  ;;  %v826_v18 = vrot.slane %v821_v9, 4  ;;  %v828_v19 = vrot.slane %v809_v8, 4 }
 0x2c9   : > { %v642_v23 = vrot.slane %v633_v15, 4  ;;  %v641_v30 = vsel %vm459_vm4, 0.0, %v640_v22  ;;  %v639_v33 = vsel %vm459_vm4, 0.0, %v638_v21  ;;  %v646_v37 = vsel %vm459_vm4, %v640_v22, %v621_v14 }
 0x2ca   : > { %v822_v24 = vrot.slane %v817_v17, 4  ;;  %v824_v25 = vrot.slane %v805_v16, 4  ;;  %v827_v26 = vsel %vm459_vm4, %v826_v18, %v809_v8  ;;  %v829_v27 = vsel %vm459_vm4, %v821_v9, %v828_v19 }
 0x2cb   : > { %v832_v28 = vpack.c.bf16 %v827_v26, %v827_v26  ;;  %v833_v29 = vpack.c.bf16 %v829_v27, %v829_v27  ;;  %v651_v38 = vrot.slane %v641_v30, 4  ;;  %v643_v39 = vsel %vm459_vm4, 0.0, %v642_v23 }
 0x2cc   : > { %v823_v31 = vsel %vm459_vm4, %v822_v24, %v805_v16  ;;  %v825_v32 = vsel %vm459_vm4, %v817_v17, %v824_v25  ;;  %v645_v40 = vsel %vm459_vm4, 0.0, %v644_v34  ;;  %v650_v41 = vperm.slane %v646_v37, %v1652_v48 }
 0x2cd   : > { %v830_v35 = vpack.c.bf16 %v823_v31, %v823_v31  ;;  %v831_v36 = vpack.c.bf16 %v825_v32, %v825_v32  ;;  %836 = vst.msk [vmem:[%s1785_s0 + $0x8] sm:$0xf] %vm573_vm5, %v832_v28  ;;  %v657_v42 = vsel %vm459_vm4, %v644_v34, %v633_v15  ;;  %v652_v43 = vsel %vm459_vm4, %v651_v38, %v639_v33 }
 0x2ce   : > { %837 = vst.msk [vmem:[%s1785_s0 + $0xc] sm:$0xf] %vm573_vm5, %v833_v29  ;;  %v661_v44 = vperm.slane %v657_v42, %v1652_v48  ;;  %v662_v45 = vrot.slane %v645_v40, 4  ;;  %v656_v46 = vperm.slane %v652_v43, %v1652_v48  ;;  %v670_v47 = vrot.slane %v650_v41, 4 }
 0x2cf   : > { %834 = vst.msk [vmem:[%s1785_s0] sm:$0xf] %vm573_vm5, %v830_v35 }
 0x2d0   : > { %835 = vst.msk [vmem:[%s1785_s0 + $0x4] sm:$0xf] %vm573_vm5, %v831_v36  ;;  %v663_v49 = vsel %vm459_vm4, %v662_v45, %v643_v39  ;;  %v682_v50 = vrot.slane %v661_v44, 4  ;;  %v668_v52 = vrot.slane %v656_v46, 4  ;;  %v671_v53 = vsel %vm459_vm4, %v656_v46, %v670_v47 }
 0x2d1   : > { %v667_v51 = vperm.slane %v663_v49, %v1652_v48  ;;  %v679_v54 = vperm.slane %v671_v53, %v1657_v55 }
 0x2d2   : > { %v669_v56 = vsel %vm459_vm4, %v668_v52, %v650_v41 }
 0x2d3   : > { %v680_v57 = vrot.slane %v667_v51, 4  ;;  %v683_v58 = vsel %vm459_vm4, %v667_v51, %v682_v50  ;;  %v675_v59 = vperm.slane %v669_v56, %v1657_v55  ;;  %v698_v61 = vrot.slane %v679_v54, 4 }
 0x2d4   : > { %v691_v60 = vperm.slane %v683_v58, %v1657_v55 }
 0x2d5   : > { %v681_v48 = vsel %vm459_vm4, %v680_v57, %v661_v44  ;;  %v694_v63 = vrot.slane %v675_v59, 4 }
 0x2d6   : > { %v687_v62 = vperm.slane %v681_v48, %v1657_v55  ;;  %v696_v0 = vrot.slane %v691_v60, 4  ;;  %v699_v1 = vsel %vm459_vm4, %v691_v60, %v698_v61 }
 0x2d7   : > { %v703_v2 = vpack.c.bf16 %v699_v1, %v699_v1 }
 0x2d8   : > { %v692_v3 = vrot.slane %v687_v62, 4  ;;  %v695_v4 = vsel %vm459_vm4, %v687_v62, %v694_v63  ;;  %v697_v5 = vsel %vm459_vm4, %v696_v0, %v679_v54 }
 0x2d9   : > { %v701_v55 = vpack.c.bf16 %v695_v4, %v695_v4  ;;  %v702_v6 = vpack.c.bf16 %v697_v5, %v697_v5  ;;  %707 = vst.msk [vmem:[%s358_s14 + $0xc] sm:$0xf] %vm573_vm5, %v703_v2 }
 0x2da   : > { %v693_v7 = vsel %vm459_vm4, %v692_v3, %v675_v59 }
 0x2db   : > { %v700_v8 = vpack.c.bf16 %v693_v7, %v693_v7  ;;  %705 = vst.msk [vmem:[%s358_s14 + $0x4] sm:$0xf] %vm573_vm5, %v701_v55 }
 0x2dc   : > { %706 = vst.msk [vmem:[%s358_s14 + $0x8] sm:$0xf] %vm573_vm5, %v702_v6 }
 0x2dd   : > { %704 = vst.msk [vmem:[%s358_s14] sm:$0xf] %vm573_vm5, %v700_v8 }
 0x2de   : > { %1389 = shalt.err (!%p1386_p7)
}
 0x2df   : > { %1122 = dma.vmem_to_hbm [thread:$0]  (%p1609_p2), %s881_s16, 256, %s883_s17, %s1839_s30, %s1922_s13, %s1922_s13, %s1494_s12  }
 0x2e0   : > { %s1404_s3 = sshra.s32 %s901_s22, 4  ;;  %s1410_s23 = scalar_lea.hbm %s1906_s7, 32  ;;  %s1405_s3 = int_to_ptr.hbm [resolvable:$true] %s1404_s3 }
 0x2e1   : > { %s1406_s8 = scalar_lea.hbm %s1405_s3, 16  ;;  %p1411_p0 = scmp.lt.s32.totalorder %s1405_s3, %s1906_s7 }
 0x2e2   : > { %p1407_p11 = scmp.ne.s32.totalorder %s1405_s3, %s1406_s8  ;;  %p1412_p4 = scmp.lt.s32.totalorder %s1410_s23, %s1406_s8 }
 0x2e4   : > { %p1408_p12 = pnand %p1407_p11, %p1609_p2  ;;  %p1413_p6 = por %p1412_p4, %p1411_p0 }
 0x2e6   : > { %p1409_p13 = pneg %p1408_p12 }
 0x2e8   : > { %p1414_p9 = pnand %p1413_p6, %p1409_p13 }
 0x2ea   : > { %1417 = shalt.err (!%p1414_p9)
}
 0x2eb   : > { %1123 = dma.vmem_to_hbm [thread:$0]  (%p1609_p2), %s1835_s18, 256, %s901_s22, %s1839_s30, %s1922_s13, %s1922_s13, %s1494_s12  }
 0x2ec PF: > { %s915_s16 = sand.u32 1, %s1460_s24   ;;  %p1139_p10 = pnand %p1076_p8, %p1581_p5 }
 0x2ed   : > { %s916_s17 = scalar_lea.sflag [#allocation4], %s915_s16 }
 0x2ee   : > { %p1140_p1 = pneg %p1139_p10 }
 0x2f0   : > { %1451 = dma.done.wait (%p1140_p1), %s916_s17, 256  }
 0x2f1   : > { %1453 = vsyncadd (%p1140_p1), %s916_s17, 4294967040  ;;  %s1923_s15 = sadd.s32 4294967294, %s1480_s29  }
 0x2f2   : > { %s925_s2 = sand.u32 1, %s1923_s15  }
 0x2f3   : > { %s926_s21 = scalar_lea.sflag [#allocation10], %s925_s2 }
 0x2f4   : > { %1455 = dma.done.wait (%p1140_p1), %s926_s21, 512  }
 0x2f5   : > { %1457 = vsyncadd (%p1140_p1), %s926_s21, 4294966784  ;;  %s28_s29 = sadd.s32 1, %s1480_s29   ;;  %s1924_s24 = smov %s1464_s25 }
 0x2f6   : > { %p25_p2 = scmp.ge.s32.totalorder %s28_s29, 4   ;;  %s1925_s25 = smov %s1468_s26 }
 0x2f7   : > { %s1926_s26 = smov %s1619_s19  ;;  %s1927_s27 = smov %s1476_s28 }
 0x2f8   : > { %s1928_s28 = smov %s1930_s11  ;;  %27 = sbr.rel (!%p25_p2) target bundleno = 14 (0xe), region = 125 }
 0x2fd   :  { %942 = vsyncpa [#allocation3], 1 }
 0x2fe   :  { %944 = vsyncpa [#allocation3 + $0x1], 1 }
 0x2ff   :  { %945 = vsyncpa [#allocation6], 1 }
 0x300   :  { %946 = vsyncpa [#allocation4], 1 }
 0x301   :  { %948 = vsyncpa [#allocation4 + $0x1], 1 }
 0x302   :  { %949 = vsyncpa [#allocation10], 1 }
 0x303   :  { %951 = vsyncpa [#allocation10 + $0x1], 1 }

</bundles_post_ra>
